<compile_context>
chip_gen: v7x
topology: tpu7x:2x2x1
jax: 0.10.0
libtpu: 0.0.40
codegen_flags: <defaults>
</compile_context>

<pallas_src>
import functools

import jax
import jax.numpy as jnp
from jax.experimental import pallas as pl
from jax.experimental.pallas import tpu as pltpu


def _layernorm_channel_kernel(w_ref, b_ref, x_ref, o_ref, *, eps):
    # w_ref/b_ref: (Bblk, 1, 1) per-batch affine params (VMEM).
    # x_ref/o_ref: (Bblk, C, tHW) tile (VMEM).  Reduction runs over axis 1 (C).
    x = x_ref[...].astype(jnp.float32)

    u = jnp.mean(x, axis=1, keepdims=True)          # (Bblk, 1, tHW)
    d = x - u
    s = jnp.mean(d * d, axis=1, keepdims=True)      # two-pass variance (stable)
    inv = jax.lax.rsqrt(s + eps)                    # EUP rsqrt, no VALU divide

    # Fold the per-batch scale into the normalization factor:
    #   out = (w * inv) * d + b   ->  one mul + one add per element, one store.
    w = w_ref[...].astype(jnp.float32)              # (Bblk, 1, 1)
    b = b_ref[...].astype(jnp.float32)
    o_ref[...] = ((w * inv) * d + b).astype(o_ref.dtype)


_LANE = 128
_LANE_CAP = 2048


def _pick_lane_tile(hw):
    """Lane tile for the spatial axis, or None if hw must be padded."""
    if hw <= _LANE_CAP:
        return hw                                   # full extent is always legal
    t = (_LANE_CAP // _LANE) * _LANE
    while t >= _LANE:
        if hw % t == 0:
            return t
        t -= _LANE
    return None                                     # no friendly divisor


def layernorm_channel(x, weight, bias, eps=1e-5):
    """x: [B, C, H, W]; weight, bias: [C].  Requires B == C (see note above)."""
    B, C, H, W = x.shape
    if B != C:
        raise ValueError(
            "The PyTorch module's (C,1,1,1) broadcast only type-checks when "
            "B == C; got B=%d C=%d" % (B, C))
    hw = H * W
    x2 = x.reshape(B, C, hw)
    # Layout plumbing only: present the per-batch affine params as (B, 1, 1)
    # so each grid step loads its (Bblk, 1, 1) slice and broadcasts it.
    w3 = weight.reshape(B, 1, 1)
    b3 = bias.reshape(B, 1, 1)

    # Lane tile for the spatial axis.  If hw is large and has no multiple-of-128
    # divisor, pad it up to a multiple of 1024 (padded columns are garbage but
    # are sliced off; the channel reduction is per spatial position, so padding
    # never contaminates real outputs).
    hw_pad = hw
    thw = _pick_lane_tile(hw)
    if thw is None:
        thw = 1024
        hw_pad = ((hw + thw - 1) // thw) * thw
        x2 = jnp.pad(x2, ((0, 0), (0, 0), (0, hw_pad - hw)))

    # Batch block: pack as many batches as fit a ~4 MiB block, measured with
    # sublane padding (C rounds up to the dtype's sublane multiple), so the
    # double-buffered in+out tiles stay well under the scoped VMEM limit.
    itemsize = jnp.dtype(x.dtype).itemsize
    sub_mult = max(8, 32 // itemsize)               # f32: 8, bf16: 16, int8: 32
    c_pad = -(-C // sub_mult) * sub_mult
    budget = 4 * 1024 * 1024
    bblk = 1
    for cand in range(1, B + 1):
        if B % cand == 0 and cand * c_pad * thw * itemsize <= budget:
            bblk = cand

    padded_block_bytes = bblk * c_pad * thw * itemsize
    vmem_limit = int(min(64 * 1024 * 1024,
                         max(32 * 1024 * 1024, 6 * padded_block_bytes)))

    kernel = functools.partial(_layernorm_channel_kernel, eps=eps)

    out = pl.pallas_call(
        kernel,
        out_shape=jax.ShapeDtypeStruct((B, C, hw_pad), x.dtype),
        grid_spec=pltpu.PrefetchScalarGridSpec(
            num_scalar_prefetch=0,
            grid=(B // bblk, hw_pad // thw),
            in_specs=[
                pl.BlockSpec((bblk, 1, 1), lambda bb, hh: (bb, 0, 0)),     # weight
                pl.BlockSpec((bblk, 1, 1), lambda bb, hh: (bb, 0, 0)),     # bias
                pl.BlockSpec((bblk, C, thw), lambda bb, hh: (bb, 0, hh)),  # x
            ],
            out_specs=pl.BlockSpec((bblk, C, thw), lambda bb, hh: (bb, 0, hh)),
        ),
        compiler_params=pltpu.CompilerParams(
            dimension_semantics=("parallel", "parallel"),
            vmem_limit_bytes=vmem_limit,
        ),
    )(w3, b3, x2)

    if hw_pad != hw:
        out = out[:, :, :hw]
    return out.reshape(B, C, H, W)


def _reference(x, weight, bias, eps=1e-5):
    # Plain-JAX replica of the PyTorch forward (same broadcast semantics:
    # weight[:, None, None, None] lines up with the batch axis since B == C).
    u = jnp.mean(x, axis=1, keepdims=True)
    s = jnp.mean((x - u) ** 2, axis=1, keepdims=True)
    xn = (x - u) / jnp.sqrt(s + eps)
    w = weight[:, None, None, None]
    b = bias[:, None, None, None]
    return w * xn + b


if __name__ == "__main__":
    key = jax.random.PRNGKey(0)
    kx, kw, kb = jax.random.split(key, 3)
    B, C, H, W = 4, 4, 16, 16  # B == C so the module's broadcast is valid

    x = jax.random.normal(kx, (B, C, H, W), dtype=jnp.float32)
    # Deterministic but non-trivial affine params so the w/b path is exercised
    # (the module's nn.Parameter init of ones/zeros would make it a no-op).
    weight = 1.0 + 0.1 * jax.random.normal(kw, (C,), dtype=jnp.float32)
    bias = 0.1 * jax.random.normal(kb, (C,), dtype=jnp.float32)

    out = layernorm_channel(x, weight, bias)
    out = jax.block_until_ready(out)

    ref = _reference(x, weight, bias)
    assert out.shape == (B, C, H, W)
    assert jnp.allclose(out, ref, atol=1e-5, rtol=1e-5), float(
        jnp.max(jnp.abs(out - ref)))

    print("KERNEL_OK")
</pallas_src>

<mosaic_0001>
module attributes {stable_mosaic.version = 11 : i64} {
  func.func @_layernorm_channel_kernel(%arg0: i32, %arg1: i32, %arg2: memref<4x1x1xf32, #tpu.memory_space<vmem>>, %arg3: memref<4x1x1xf32, #tpu.memory_space<vmem>>, %arg4: memref<4x4x256xf32, #tpu.memory_space<vmem>>, %arg5: memref<4x4x256xf32, #tpu.memory_space<vmem>>) attributes {dimension_semantics = [#tpu.dimension_semantics<parallel>, #tpu.dimension_semantics<parallel>], iteration_bounds = array<i64: 1, 1>, scalar_prefetch = 0 : i64, scratch_operands = 0 : i64, tpu.core_type = #tpu.core_type<tc>, window_params = [{transform_indices = @transform_0, window_bounds = array<i64: 4, 1, 1>}, {transform_indices = @transform_1, window_bounds = array<i64: 4, 1, 1>}, {transform_indices = @transform_2, window_bounds = array<i64: 4, 4, 256>}, {transform_indices = @transform_3, window_bounds = array<i64: 4, 4, 256>}]} {
    %c0 = arith.constant 0 : index
    %c0_0 = arith.constant 0 : index
    %c0_1 = arith.constant 0 : index
    %0 = vector.load %arg4[%c0, %c0_0, %c0_1] : memref<4x4x256xf32, #tpu.memory_space<vmem>>, vector<4x4x256xf32>
    %cst = arith.constant dense<0.000000e+00> : vector<4x256xf32>
    %1 = vector.multi_reduction <add>, %0, %cst [1] : vector<4x4x256xf32> to vector<4x256xf32>
    %2 = vector.shape_cast %1 : vector<4x256xf32> to vector<4x1x256xf32>
    %cst_2 = arith.constant 4.000000e+00 : f32
    %3 = vector.broadcast %cst_2 : f32 to vector<4x1x256xf32>
    %4 = arith.divf %2, %3 : vector<4x1x256xf32>
    %5 = vector.broadcast %4 : vector<4x1x256xf32> to vector<4x4x256xf32>
    %6 = arith.subf %0, %5 : vector<4x4x256xf32>
    %7 = arith.mulf %6, %6 : vector<4x4x256xf32>
    %cst_3 = arith.constant dense<0.000000e+00> : vector<4x256xf32>
    %8 = vector.multi_reduction <add>, %7, %cst_3 [1] : vector<4x4x256xf32> to vector<4x256xf32>
    %9 = vector.shape_cast %8 : vector<4x256xf32> to vector<4x1x256xf32>
    %cst_4 = arith.constant 4.000000e+00 : f32
    %10 = vector.broadcast %cst_4 : f32 to vector<4x1x256xf32>
    %11 = arith.divf %9, %10 : vector<4x1x256xf32>
    %cst_5 = arith.constant 9.99999974E-6 : f32
    %12 = vector.broadcast %cst_5 : f32 to vector<4x1x256xf32>
    %13 = arith.addf %11, %12 : vector<4x1x256xf32>
    %14 = math.rsqrt %13 : vector<4x1x256xf32>
    %c0_6 = arith.constant 0 : index
    %c0_7 = arith.constant 0 : index
    %c0_8 = arith.constant 0 : index
    %15 = vector.load %arg2[%c0_6, %c0_7, %c0_8] : memref<4x1x1xf32, #tpu.memory_space<vmem>>, vector<4x1x1xf32>
    %c0_9 = arith.constant 0 : index
    %c0_10 = arith.constant 0 : index
    %c0_11 = arith.constant 0 : index
    %16 = vector.load %arg3[%c0_9, %c0_10, %c0_11] : memref<4x1x1xf32, #tpu.memory_space<vmem>>, vector<4x1x1xf32>
    %17 = vector.broadcast %15 : vector<4x1x1xf32> to vector<4x1x256xf32>
    %18 = arith.mulf %17, %14 : vector<4x1x256xf32>
    %19 = vector.broadcast %18 : vector<4x1x256xf32> to vector<4x4x256xf32>
    %20 = arith.mulf %19, %6 : vector<4x4x256xf32>
    %21 = vector.broadcast %16 : vector<4x1x1xf32> to vector<4x4x256xf32>
    %22 = arith.addf %20, %21 : vector<4x4x256xf32>
    %c0_12 = arith.constant 0 : index
    %c0_13 = arith.constant 0 : index
    %c0_14 = arith.constant 0 : index
    %23 = vector.load %arg5[%c0_12, %c0_13, %c0_14] : memref<4x4x256xf32, #tpu.memory_space<vmem>>, vector<4x4x256xf32>
    tpu.vector_store %arg5[%c0_12, %c0_13, %c0_14], %22 {strides = array<i32>} : memref<4x4x256xf32, #tpu.memory_space<vmem>>, vector<4x4x256xf32>,
    return
  }
  func.func @transform_0(%arg0: i32, %arg1: i32) -> (i32, i32, i32) {
    %c0_i32 = arith.constant 0 : i32
    %c0_i32_0 = arith.constant 0 : i32
    %c0_i32_1 = arith.constant 0 : i32
    return %arg0, %c0_i32, %c0_i32_0 : i32, i32, i32
  }
  func.func @transform_1(%arg0: i32, %arg1: i32) -> (i32, i32, i32) {
    %c0_i32 = arith.constant 0 : i32
    %c0_i32_0 = arith.constant 0 : i32
    %c0_i32_1 = arith.constant 0 : i32
    return %arg0, %c0_i32, %c0_i32_0 : i32, i32, i32
  }
  func.func @transform_2(%arg0: i32, %arg1: i32) -> (i32, i32, i32) {
    %c0_i32 = arith.constant 0 : i32
    %c0_i32_0 = arith.constant 0 : i32
    return %arg0, %c0_i32, %arg1 : i32, i32, i32
  }
  func.func @transform_3(%arg0: i32, %arg1: i32) -> (i32, i32, i32) {
    %c0_i32 = arith.constant 0 : i32
    %c0_i32_0 = arith.constant 0 : i32
    return %arg0, %c0_i32, %arg1 : i32, i32, i32
  }
}

</mosaic_0001>

<bundles_post_ra>
// kernel: tpu_custom_call.1
= control target key start
LH: loop header
LB: loop body
LE: loop exit
PB: predicated region body
PF: predicated region fallthrough
CT: control target
= control target key end

     0   :  { %8 = vsyncpa [#allocation3], 0  ;;  %s606_s0 = inlined_call_operand.vmem [shape: f32[4,1,1], index: 0, kind: input, shape index: {}]   ;;  %s607_s1 = inlined_call_operand.vmem [shape: f32[4,1,1], index: 1, kind: input, shape index: {}]   ;;  %s608_s2 = inlined_call_operand.hbm [shape: f32[4,4,256], index: 2, kind: input, shape index: {}]   ;;  %s609_s3 = inlined_call_operand.hbm [shape: f32[4,4,256], index: 3, kind: output, shape index: {}]  }
   0x1   :  { %9 = vsyncpa [#allocation4], 0  ;;  %s459_s12 = smov [#allocation2]   ;;  %s411_s16 = scalar_lea.hbm %s608_s2, 512 }
   0x2   :  { %s19_s13 = sshll.u32 %s459_s12, 4  ;;  %p412_p0 = scmp.ne.s32.totalorder %s608_s2, %s411_s16  ;;  %s20_s13 = int_to_ptr.vmem [resolvable:$true] %s19_s13 }
   0x3   :  { %p415_p1 = scmp.lt.u32.totalorder %s411_s16, %s608_s2 }
   0x5   :  { %p417_p2 = pnand %p415_p1, %p412_p0 }
   0x7   :  { %420 = shalt.err (!%p417_p2)
}
   0x8   :  { %s421_s21 = scalar_lea.vmem %s20_s13, 512  ;;  %p426_p4 = scmp.lt.s32.totalorder %s20_s13, %s20_s13 }
   0x9   :  { %p422_p3 = scmp.ne.s32.totalorder %s20_s13, %s421_s21  ;;  %p427_p5 = scmp.lt.s32.totalorder %s421_s21, %s421_s21 }
   0xb   :  { %p428_p6 = por %p427_p5, %p426_p4 }
   0xd   :  { %p429_p7 = pnand %p428_p6, %p422_p3 }
   0xf   :  { %432 = shalt.err (!%p429_p7)
}
  0x10   :  { %s460_s22 = smov 128   ;;  %s461_s23 = smov 8  }
  0x11   :  { %25 = dma.hbm_to_vmem [thread:$0]  %s608_s2, 512, %s20_s13, [#allocation3], %s460_s22, %s460_s22, %s461_s23  }
  0x12   :  { %455 = dma.done.wait [#allocation3], 512  }
  0x13   :  { %456 = vsyncadd [#allocation3], 4294966784  ;;  %v462_v0 = vmov 0   ;;  %v229_v1 = vld [vmem:[%s606_s0 + $0x2] sm:$0x1]  ;;  %v525_v10 = vld [vmem:[#allocation2 + $0x18] sm:$0xff] }
  0x14   :  { %390 = vset.pattern.permute.xlu1 %v462_v0  ;;  %389 = vset.pattern.permute.xlu0 %v462_v0  ;;  %v227_v2 = vld [vmem:[%s606_s0] sm:$0x1]  ;;  %v230_v3 = vld [vmem:[%s606_s0 + $0x3] sm:$0x1]  ;;  %v228_v4 = vld [vmem:[%s606_s0 + $0x1] sm:$0x1]  ;;  %v40_v14 = vcombine.high %v525_v10, %v525_v10 }
  0x15   :  { %255 = vperm.xlu1 %390, %v229_v1   ;;  %237 = vperm.xlu0 %389, %v227_v2   ;;  %v381_v5 = vld [vmem:[%s607_s1 + $0x1] ss:$0 sm:$0xff]  ;;  %v380_v6 = vld [vmem:[%s607_s1] ss:$0 sm:$0xff]  ;;  %v383_v7 = vld [vmem:[%s607_s1 + $0x3] ss:$0 sm:$0xff] }
  0x16   :  { %v382_v8 = vld [vmem:[%s607_s1 + $0x2] ss:$0 sm:$0xff]  ;;  %v527_v11 = vld [vmem:[#allocation2 + $0x10] sm:$0xff]  ;;  %vm45_vm0 = vcmask 1043456   ;;  %v531_v13 = vld [vmem:[#allocation2 + $0x8] sm:$0xff]  ;;  %s463_s0 = smov [#allocation5]  }
  0x17   :  { %v523_v9 = vld [vmem:[#allocation2] sm:$0xff]  ;;  %v39_v15 = vcombine.high %v527_v11, %v527_v11  ;;  %v38_v18 = vcombine.high %v531_v13, %v531_v13  ;;  %v88_v19 = vsel %vm45_vm0, %v525_v10, 0.0  ;;  %v95_v20 = vsel %vm45_vm0, %v40_v14, 0.0  ;;  %s368_s1 = sshll.u32 %s463_s0, 4  ;;  %s369_s1 = int_to_ptr.vmem [resolvable:$true] %s368_s1 }
  0x18   :  { %v37_v12 = vcombine.high %v523_v9, %v523_v9  ;;  %v46_v16 = vsel %vm45_vm0, %v523_v9, 0.0  ;;  %v74_v21 = vsel %vm45_vm0, %v527_v11, 0.0  ;;  %v60_v25 = vsel %vm45_vm0, %v531_v13, 0.0  ;;  %s433_s14 = scalar_lea.vmem %s369_s1, 512  ;;  %p438_p9 = scmp.lt.s32.totalorder %s369_s1, %s369_s1 }
  0x19   :  { %264 = vperm.xlu1 %390, %v230_v3   ;;  %246 = vperm.xlu0 %389, %v228_v4   ;;  %v81_v22 = vsel %vm45_vm0, %v39_v15, 0.0  ;;  %v47_v23 = vrot.slane %v46_v16, 4  ;;  %v67_v26 = vsel %vm45_vm0, %v38_v18, 0.0  ;;  %v89_v27 = vrot.slane %v88_v19, 4  ;;  %p434_p8 = scmp.ne.s32.totalorder %s369_s1, %s433_s14  ;;  %p439_p10 = scmp.lt.s32.totalorder %s433_s14, %s433_s14 }
  0x1a   :  { %v53_v17 = vsel %vm45_vm0, %v37_v12, 0.0  ;;  %v96_v28 = vrot.slane %v95_v20, 4  ;;  %v75_v29 = vrot.slane %v74_v21, 4  ;;  %v82_v30 = vrot.slane %v81_v22, 4 }
  0x1b   :  { %v54_v24 = vrot.slane %v53_v17, 4  ;;  %v48_v31 = vadd.f32 %v47_v23, %v46_v16  ;;  %v61_v33 = vrot.slane %v60_v25, 4  ;;  %v68_v34 = vrot.slane %v67_v26, 4  ;;  %p440_p11 = por %p439_p10, %p438_p9 }
  0x1c   :  { %v90_v35 = vadd.f32 %v89_v27, %v88_v19  ;;  %v97_v36 = vadd.f32 %v96_v28, %v95_v20  ;;  %v76_v37 = vadd.f32 %v75_v29, %v74_v21  ;;  %v83_v38 = vadd.f32 %v82_v30, %v81_v22 }
  0x1d   :  { %324 = vperm.xlu1 %390, %v381_v5   ;;  %320 = vperm.xlu0 %389, %v380_v6   ;;  %v55_v32 = vadd.f32 %v54_v24, %v53_v17  ;;  %v49_v39 = vrot.slane %v48_v31, 2  ;;  %v62_v41 = vadd.f32 %v61_v33, %v60_v25  ;;  %v69_v42 = vadd.f32 %v68_v34, %v67_v26  ;;  %p441_p12 = pnand %p440_p11, %p434_p8 }
  0x1e   :  { %v91_v43 = vrot.slane %v90_v35, 2  ;;  %v98_v44 = vrot.slane %v97_v36, 2  ;;  %v77_v45 = vrot.slane %v76_v37, 2  ;;  %v84_v46 = vrot.slane %v83_v38, 2 }
  0x1f   :  { %v56_v40 = vrot.slane %v55_v32, 2  ;;  %v50_v47 = vadd.f32 %v49_v39, %v48_v31  ;;  %v63_v49 = vrot.slane %v62_v41, 2  ;;  %v70_v50 = vrot.slane %v69_v42, 2 }
  0x20   :  { %v92_v51 = vadd.f32 %v91_v43, %v90_v35  ;;  %v99_v52 = vadd.f32 %v98_v44, %v97_v36  ;;  %v78_v53 = vadd.f32 %v77_v45, %v76_v37  ;;  %v85_v54 = vadd.f32 %v84_v46, %v83_v38 }
  0x21   :  { %332 = vperm.xlu1 %390, %v383_v7   ;;  %328 = vperm.xlu0 %389, %v382_v8   ;;  %v57_v48 = vadd.f32 %v56_v40, %v55_v32  ;;  %v51_v55 = vrot.slane %v50_v47, 1  ;;  %v64_v57 = vadd.f32 %v63_v49, %v62_v41  ;;  %v71_v58 = vadd.f32 %v70_v50, %v69_v42 }
  0x22   :  { %v93_v59 = vrot.slane %v92_v51, 1  ;;  %v100_v60 = vrot.slane %v99_v52, 1  ;;  %v79_v61 = vrot.slane %v78_v53, 1  ;;  %v86_v62 = vrot.slane %v85_v54, 1 }
  0x23   :  { %v58_v56 = vrot.slane %v57_v48, 1  ;;  %v52_v63 = vadd.f32 %v51_v55, %v50_v47  ;;  %v65_v1 = vrot.slane %v64_v57, 1  ;;  %v72_v2 = vrot.slane %v71_v58, 1 }
  0x24   :  { %v94_v3 = vadd.f32 %v93_v59, %v92_v51  ;;  %v101_v4 = vadd.f32 %v100_v60, %v99_v52  ;;  %v80_v5 = vadd.f32 %v79_v61, %v78_v53  ;;  %v87_v6 = vadd.f32 %v86_v62, %v85_v54 }
  0x25   :  { %v59_v0 = vadd.f32 %v58_v56, %v57_v48  ;;  %v103_v7 = vmul.f32 0.25, %v52_v63  ;;  %v66_v12 = vadd.f32 %v65_v1, %v64_v57  ;;  %v73_v14 = vadd.f32 %v72_v2, %v71_v58 }
  0x26   :  { %v109_v15 = vmul.f32 0.25, %v94_v3  ;;  %v110_v16 = vmul.f32 0.25, %v101_v4  ;;  %v107_v17 = vmul.f32 0.25, %v80_v5  ;;  %v108_v18 = vmul.f32 0.25, %v87_v6 }
  0x27   :  { %v104_v8 = vmul.f32 0.25, %v59_v0  ;;  %v105_v20 = vmul.f32 0.25, %v66_v12  ;;  %v106_v21 = vmul.f32 0.25, %v73_v14 }
  0x28   :  { %v122_v22 = vcombine.low %v109_v15, %v110_v16  ;;  %v121_v23 = vcombine.low %v107_v17, %v108_v18 }
  0x29   :  { %v119_v19 = vcombine.low %v103_v7, %v104_v8  ;;  %v120_v25 = vcombine.low %v105_v20, %v106_v21 }
  0x2a   :  { %v555_v26 = vsub.f32 %v525_v10, %v122_v22  ;;  %v558_v27 = vsub.f32 %v527_v11, %v121_v23 }
  0x2b   :  { %v552_v24 = vsub.f32 %v523_v9, %v119_v19  ;;  %v563_v29 = vsub.f32 %v531_v13, %v120_v25 }
  0x2c   :  { %v134_v30 = vmul.f32 %v555_v26, %v555_v26  ;;  %v133_v9 = vmul.f32 %v558_v27, %v558_v27 }
  0x2d   :  { %v131_v28 = vmul.f32 %v552_v24, %v552_v24  ;;  %v132_v10 = vmul.f32 %v563_v29, %v563_v29 }
  0x2e   :  { %v175_v32 = vsel %vm45_vm0, %v133_v9, 0.0  ;;  %v142_v11 = vcombine.high %v134_v30, %v134_v30  ;;  %v141_v13 = vcombine.high %v133_v9, %v133_v9  ;;  %v189_v37 = vsel %vm45_vm0, %v134_v30, 0.0 }
  0x2f   :  { %v139_v31 = vcombine.high %v131_v28, %v131_v28  ;;  %v147_v33 = vsel %vm45_vm0, %v131_v28, 0.0  ;;  %v140_v35 = vcombine.high %v132_v10, %v132_v10  ;;  %v176_v36 = vrot.slane %v175_v32, 4 }
  0x30   :  { %v148_v38 = vrot.slane %v147_v33, 4  ;;  %v196_v39 = vsel %vm45_vm0, %v142_v11, 0.0  ;;  %v161_v41 = vsel %vm45_vm0, %v132_v10, 0.0  ;;  %v190_v42 = vrot.slane %v189_v37, 4 }
  0x31   :  { %v154_v34 = vsel %vm45_vm0, %v139_v31, 0.0  ;;  %v168_v43 = vsel %vm45_vm0, %v140_v35, 0.0  ;;  %v177_v44 = vadd.f32 %v176_v36, %v175_v32  ;;  %v182_v45 = vsel %vm45_vm0, %v141_v13, 0.0 }
  0x32   :  { %v155_v40 = vrot.slane %v154_v34, 4  ;;  %v197_v46 = vrot.slane %v196_v39, 4  ;;  %v149_v47 = vadd.f32 %v148_v38, %v147_v33  ;;  %v162_v48 = vrot.slane %v161_v41, 4 }
  0x33   :  { %v169_v50 = vrot.slane %v168_v43, 4  ;;  %v183_v51 = vrot.slane %v182_v45, 4  ;;  %v191_v52 = vadd.f32 %v190_v42, %v189_v37  ;;  %v178_v53 = vrot.slane %v177_v44, 2 }
  0x34   :  { %v156_v49 = vadd.f32 %v155_v40, %v154_v34  ;;  %v198_v54 = vadd.f32 %v197_v46, %v196_v39  ;;  %v150_v55 = vrot.slane %v149_v47, 2  ;;  %v163_v56 = vadd.f32 %v162_v48, %v161_v41 }
  0x35   :  { %v170_v58 = vadd.f32 %v169_v50, %v168_v43  ;;  %v184_v59 = vadd.f32 %v183_v51, %v182_v45  ;;  %v192_v60 = vrot.slane %v191_v52, 2  ;;  %v179_v61 = vadd.f32 %v178_v53, %v177_v44 }
  0x36   :  { %v157_v57 = vrot.slane %v156_v49, 2  ;;  %v199_v62 = vrot.slane %v198_v54, 2  ;;  %v151_v63 = vadd.f32 %v150_v55, %v149_v47  ;;  %v164_v0 = vrot.slane %v163_v56, 2 }
  0x37   :  { %v171_v2 = vrot.slane %v170_v58, 2  ;;  %v185_v3 = vrot.slane %v184_v59, 2  ;;  %v193_v4 = vadd.f32 %v192_v60, %v191_v52  ;;  %v180_v5 = vrot.slane %v179_v61, 1 }
  0x38   :  { %v158_v1 = vadd.f32 %v157_v57, %v156_v49  ;;  %v200_v6 = vadd.f32 %v199_v62, %v198_v54  ;;  %v152_v7 = vrot.slane %v151_v63, 1  ;;  %v165_v8 = vadd.f32 %v164_v0, %v163_v56 }
  0x39   :  { %v172_v14 = vadd.f32 %v171_v2, %v170_v58  ;;  %v186_v15 = vadd.f32 %v185_v3, %v184_v59  ;;  %v194_v16 = vrot.slane %v193_v4, 1  ;;  %v181_v17 = vadd.f32 %v180_v5, %v179_v61 }
  0x3a   :  { %v159_v12 = vrot.slane %v158_v1, 1  ;;  %v201_v18 = vrot.slane %v200_v6, 1  ;;  %v153_v19 = vadd.f32 %v152_v7, %v151_v63  ;;  %v166_v20 = vrot.slane %v165_v8, 1 }
  0x3b   :  { %v173_v22 = vrot.slane %v172_v14, 1  ;;  %v187_v23 = vrot.slane %v186_v15, 1  ;;  %v195_v25 = vadd.f32 %v194_v16, %v193_v4  ;;  %v207_v28 = vmul.f32 0.25, %v181_v17 }
  0x3c   :  { %v160_v21 = vadd.f32 %v159_v12, %v158_v1  ;;  %v202_v30 = vadd.f32 %v201_v18, %v200_v6  ;;  %v203_v9 = vmul.f32 0.25, %v153_v19  ;;  %v167_v31 = vadd.f32 %v166_v20, %v165_v8 }
  0x3d   :  { %v174_v32 = vadd.f32 %v173_v22, %v172_v14  ;;  %v188_v11 = vadd.f32 %v187_v23, %v186_v15  ;;  %v209_v33 = vmul.f32 0.25, %v195_v25  ;;  %v215_v34 = vadd.f32 1e-05, %v207_v28 }
  0x3e   :  { %v204_v10 = vmul.f32 0.25, %v160_v21  ;;  %v210_v35 = vmul.f32 0.25, %v202_v30  ;;  %v211_v13 = vadd.f32 1e-05, %v203_v9  ;;  %v205_v36 = vmul.f32 0.25, %v167_v31 }
  0x3f   :  { %v206_v38 = vmul.f32 0.25, %v174_v32  ;;  %v208_v39 = vmul.f32 0.25, %v188_v11  ;;  %v217_v40 = vadd.f32 1e-05, %v209_v33  ;;  %395 = vrsqrt.f32 %v215_v34 }
  0x40   :  { %v212_v37 = vadd.f32 1e-05, %v204_v10  ;;  %v218_v41 = vadd.f32 1e-05, %v210_v35  ;;  %v240_v42 = vlaneseq  ;;  %397 = vrsqrt.f32 %v211_v13 }
  0x41   :  { %v213_v43 = vadd.f32 1e-05, %v205_v36  ;;  %v214_v44 = vadd.f32 1e-05, %v206_v38  ;;  %v216_v45 = vadd.f32 1e-05, %v208_v39  ;;  %v283_v57 = vcombine.high %v552_v24, %v552_v24 }
  0x42   :  { %399 = vrsqrt.f32 %v212_v37  ;;  %v241_v46 = vshrl.u32 %v240_v42, 7  ;;  %v284_v3 = vcombine.high %v563_v29, %v563_v29  ;;  %v286_v7 = vcombine.high %v555_v26, %v555_v26 }
  0x43   :  { %401 = vrsqrt.f32 %v217_v40  ;;  %v285_v19 = vcombine.high %v558_v27, %v558_v27 }
  0x44   :  { %403 = vrsqrt.f32 %v218_v41  ;;  %v242_v47 = vsub.s32 0, %v241_v46 }
  0x45   :  { %405 = vrsqrt.f32 %v213_v43 }
  0x46   :  { %407 = vrsqrt.f32 %v214_v44 }
  0x47   :  { %409 = vrsqrt.f32 %v216_v45 }
  0x49   :  { %v396_v48 = vpop.eup %395 }
  0x4a   :  { %v398_v49 = vpop.eup %397 }
  0x4c   :  { %v400_v50 = vpop.eup %399 }
  0x4d   :  { %v402_v53 = vpop.eup %401 }
  0x4e   :  { %v404_v55 = vpop.eup %403 }
  0x4f   :  { %v406_v58 = vpop.eup %405 }
  0x50   :  { %v408_v61 = vpop.eup %407 }
  0x51   :  { %v410_v0 = vpop.eup %409 }
  0x94   :  { %v256_v51 = vpop.permute.xlu1 %255  ;;  %v238_v52 = vpop.permute.xlu0 %237 }
  0x95   :  { %v243_v54 = vrot.slane %v238_v52, %v242_v47  ;;  %v261_v56 = vrot.slane %v256_v51, %v242_v47 }
  0x97   :  { %v271_v59 = vmul.f32 %v398_v49, %v243_v54  ;;  %v272_v60 = vmul.f32 %v400_v50, %v243_v54  ;;  %v275_v4 = vmul.f32 %v396_v48, %v261_v56  ;;  %v276_v16 = vmul.f32 %v410_v0, %v261_v56 }
  0x98   :  { %v265_v62 = vpop.permute.xlu1 %264  ;;  %v247_v63 = vpop.permute.xlu0 %246 }
  0x99   :  { %v270_v1 = vrot.slane %v265_v62, %v242_v47  ;;  %v252_v2 = vrot.slane %v247_v63, %v242_v47  ;;  %v291_v5 = vmul.f32 %v271_v59, %v552_v24  ;;  %v292_v6 = vmul.f32 %v283_v57, %v272_v60 }
  0x9a   :  { %v295_v25 = vmul.f32 %v275_v4, %v558_v27  ;;  %v296_v11 = vmul.f32 %v285_v19, %v276_v16 }
  0x9b   :  { %v277_v8 = vmul.f32 %v402_v53, %v270_v1  ;;  %v278_v12 = vmul.f32 %v404_v55, %v270_v1  ;;  %v273_v14 = vmul.f32 %v406_v58, %v252_v2  ;;  %v274_v15 = vmul.f32 %v408_v61, %v252_v2 }
  0x9c   :  { %v325_v17 = vpop.permute.xlu1 %324  ;;  %v321_v18 = vpop.permute.xlu0 %320 }
  0x9d   :  { %v293_v20 = vmul.f32 %v273_v14, %v563_v29  ;;  %v294_v21 = vmul.f32 %v284_v3, %v274_v15  ;;  %v335_v22 = vadd.f32 %v321_v18, %v291_v5  ;;  %v336_v23 = vadd.f32 %v321_v18, %v292_v6 }
  0x9e   :  { %v297_v24 = vmul.f32 %v277_v8, %v555_v26  ;;  %v298_v31 = vmul.f32 %v286_v7, %v278_v12 }
  0x9f   :  { %v337_v28 = vadd.f32 %v325_v17, %v293_v20  ;;  %v338_v30 = vadd.f32 %v325_v17, %v294_v21  ;;  %v351_v9 = vcombine.low %v335_v22, %v336_v23 }
  0xa0   :  { %v333_v10 = vpop.permute.xlu1 %332  ;;  %v329_v32 = vpop.permute.xlu0 %328 }
  0xa1   :  { %v352_v33 = vcombine.low %v337_v28, %v338_v30  ;;  %359 = vst [vmem:[#allocation5] sm:$0xff] %v351_v9  ;;  %v341_v34 = vadd.f32 %v333_v10, %v297_v24  ;;  %v342_v35 = vadd.f32 %v333_v10, %v298_v31  ;;  %v339_v13 = vadd.f32 %v329_v32, %v295_v25 }
  0xa2   :  { %v340_v29 = vadd.f32 %v329_v32, %v296_v11 }
  0xa3   :  { %360 = vst [vmem:[#allocation5 + $0x8] sm:$0xff] %v352_v33  ;;  %v354_v36 = vcombine.low %v341_v34, %v342_v35 }
  0xa4   :  { %v353_v26 = vcombine.low %v339_v13, %v340_v29 }
  0xa5   :  { %362 = vst [vmem:[#allocation5 + $0x18] sm:$0xff] %v354_v36 }
  0xa6   :  { %361 = vst [vmem:[#allocation5 + $0x10] sm:$0xff] %v353_v26 }
  0xa7   :  { %444 = shalt.err (!%p441_p12)
}
  0xa8   :  { %s445_s17 = scalar_lea.hbm %s609_s3, 512 }
  0xa9   :  { %p446_p13 = scmp.ne.s32.totalorder %s609_s3, %s445_s17  ;;  %p449_p0 = scmp.lt.u32.totalorder %s445_s17, %s609_s3 }
  0xab   :  { %p451_p1 = pnand %p449_p0, %p446_p13 }
  0xad   :  { %454 = shalt.err (!%p451_p1)
}
  0xae   :  { %374 = dma.vmem_to_hbm [thread:$0]  %s369_s1, 512, %s609_s3, [#allocation4], %s460_s22, %s460_s22, %s461_s23  }
  0xaf   :  { %457 = dma.done.wait [#allocation4], 512  }
  0xb0   :  { %458 = vsyncadd [#allocation4], 4294966784 }
  0xb1   :  { %378 = vsyncpa [#allocation3], 1 }
  0xb2   :  { %379 = vsyncpa [#allocation4], 1 }

</bundles_post_ra>
